<compile_context>
chip_gen: v7x
topology: tpu7x:2x2x1
jax: 0.10.0
libtpu: 0.0.40
codegen_flags: <defaults>
</compile_context>

<pallas_src>
import math
import functools

import jax
import jax.numpy as jnp
from jax.experimental import pallas as pl
from jax.experimental.pallas import tpu as pltpu


# ------------------------------------------------------------------ utilities
def _round_up(v, m):
    return ((v + m - 1) // m) * m


_VMEM_LIMIT_BYTES = 48 << 20      # < v7x's 64 MiB physical VMEM, with headroom
_FUSED_BLOCK_BYTES = 4 << 20      # f32-equivalent per-batch slab gate for fusion


def _tile_budget_bytes():
    """Per-buffer spatial-tile budget for the two-pass fallback (by chip gen)."""
    try:
        kind = jax.devices()[0].device_kind.lower()
    except Exception:
        kind = ""
    if "v5e" in kind or ("v5" in kind and "lite" in kind):
        return 2 << 20            # v5e: ~0.8 TB/s, 1-2 MiB tiles already ~85% roofline
    return 6 << 20                # v6e / v7x: larger tiles recover the HBM roofline


def _pick_tile(hw, c, budget_bytes):
    """Largest spatial tile (multiple of 128 lanes) under the VMEM budget.
    No divisibility requirement: grid = cdiv(hw, ts); the ragged last tile is
    handled inside the kernels (no host-side padding)."""
    cap = max(128, (budget_bytes // (4 * c)) // 128 * 128)
    return min(cap, _round_up(hw, 128))


# ------------------------------------------------------ fused single-pass kernel
def _fused_kernel(x_ref, w1_ref, w2_ref, b1_ref, b2_ref, o_ref, *, inv_hw):
    """Pool + squeeze/excite + rescale on one whole batch slab (resident in VMEM).

    x_ref : (1, C, HW)  activation slab (spatial on lanes)
    w1_ref: (Dp, C)     conv_du[0] weight (zero-padded rows D..Dp)
    w2_ref: (C, Dp)     conv_du[2] weight (zero-padded cols D..Dp)
    b1_ref: (Dp, 1), b2_ref: (C, 1)   biases (zeros when bias=False)
    o_ref : (1, C, HW)  output slab
    """
    x = x_ref[...]                                                  # (1, C, HW)
    pooled = jnp.sum(x[0].astype(jnp.float32), axis=1, keepdims=True)   # (C, 1)
    # lane-broadcast the pooled mean to (C, 128) for the tiny MXU matmuls
    mean = jnp.zeros((pooled.shape[0], 128), jnp.float32) + pooled * inv_hw
    z = jnp.dot(w1_ref[...], mean,
                preferred_element_type=jnp.float32) + b1_ref[...]
    z = jnp.maximum(z, 0.0)                                         # (Dp, 128)
    att = jax.nn.sigmoid(
        jnp.dot(w2_ref[...], z,
                preferred_element_type=jnp.float32) + b2_ref[...])  # (C, 128)
    scale = att[None, :, 0:1]                                       # (1, C, 1)
    o_ref[...] = (x * scale).astype(o_ref.dtype)


# ------------------------------------------------------- two-pass fallback kernels
def _pool_du_kernel(x_ref, w1_ref, w2_ref, b1_ref, b2_ref, y_ref, acc_ref,
                    *, inv_hw, hw, ts, ragged):
    """Global average pool (tiled over spatial) + fused squeeze/excite MLP."""
    s = pl.program_id(1)

    @pl.when(s == 0)
    def _init():
        acc_ref[...] = jnp.zeros_like(acc_ref)

    tile = x_ref[...][0].astype(jnp.float32)                        # (C, ts)
    if ragged:
        # Last tile overhangs HW: out-of-bounds lanes contain garbage -> mask.
        lane = jax.lax.broadcasted_iota(jnp.int32, tile.shape, 1)
        tile = jnp.where(s * ts + lane < hw, tile, 0.0)
    acc_ref[...] += jnp.sum(tile, axis=1, keepdims=True)            # lane-broadcast add

    @pl.when(s == pl.num_programs(1) - 1)
    def _finalize():
        mean = acc_ref[...] * inv_hw                                # (C, 128)
        z = jnp.dot(w1_ref[...], mean,
                    preferred_element_type=jnp.float32) + b1_ref[...]
        z = jnp.maximum(z, 0.0)                                     # (Dp, 128)
        att = jax.nn.sigmoid(
            jnp.dot(w2_ref[...], z,
                    preferred_element_type=jnp.float32) + b2_ref[...])
        y_ref[...] = att.reshape(y_ref.shape).astype(y_ref.dtype)


def _scale_kernel(x_ref, y_ref, o_ref):
    """out = x * attention (per batch & channel), lane-dense tiles."""
    att = y_ref[...][:, :, 0:1]                                     # (1, C, 1)
    o_ref[...] = (x_ref[...] * att).astype(o_ref.dtype)


# ------------------------------------------------------------------ CA layer
def ca_layer(params, x, *, path="auto", tile_override=None):
    """CALayer forward.  x: (B, C, H, W) (f32 or bf16), returns same shape/dtype.

    path: "auto" | "fused" | "two_pass".  "auto" uses the fused single-pass
    kernel whenever a (C, H*W) batch slab fits the VMEM gate.
    """
    B, C, H, W = x.shape
    HW = H * W
    xf = x.reshape(B, C, HW)                    # contiguous reshape: no HBM copy

    w1, w2, b1, b2 = params['w1'], params['w2'], params['b1'], params['b2']
    Dp = w1.shape[0]
    inv_hw = 1.0 / HW

    use_fused = (path == "fused") or (
        path == "auto" and C * HW * 4 <= _FUSED_BLOCK_BYTES)

    if use_fused:
        # ---- single pass: pool + SE + rescale, 1 read + 1 write of x -------
        out = pl.pallas_call(
            functools.partial(_fused_kernel, inv_hw=inv_hw),
            out_shape=jax.ShapeDtypeStruct((B, C, HW), x.dtype),
            grid_spec=pltpu.PrefetchScalarGridSpec(
                num_scalar_prefetch=0,
                grid=(B,),
                in_specs=[
                    pl.BlockSpec((1, C, HW), lambda b: (b, 0, 0)),
                    pl.BlockSpec((Dp, C), lambda b: (0, 0)),
                    pl.BlockSpec((C, Dp), lambda b: (0, 0)),
                    pl.BlockSpec((Dp, 1), lambda b: (0, 0)),
                    pl.BlockSpec((C, 1), lambda b: (0, 0)),
                ],
                out_specs=pl.BlockSpec((1, C, HW), lambda b: (b, 0, 0)),
            ),
            compiler_params=pltpu.CompilerParams(
                dimension_semantics=("parallel",),
                vmem_limit_bytes=_VMEM_LIMIT_BYTES),
        )(xf, w1, w2, b1, b2)
        return out.reshape(B, C, H, W)

    # -------- two-pass fallback for large H*W --------------------------------
    ts = tile_override if tile_override is not None else _pick_tile(
        HW, C, _tile_budget_bytes())
    S = (HW + ts - 1) // ts
    ragged = (HW % ts) != 0

    # ---- kernel 1: fused global-average-pool + conv_du (squeeze/excite) ----
    y = pl.pallas_call(
        functools.partial(_pool_du_kernel, inv_hw=inv_hw, hw=HW, ts=ts,
                          ragged=ragged),
        out_shape=jax.ShapeDtypeStruct((B, C, 128), jnp.float32),
        grid_spec=pltpu.PrefetchScalarGridSpec(
            num_scalar_prefetch=0,
            grid=(B, S),
            in_specs=[
                pl.BlockSpec((1, C, ts), lambda b, s: (b, 0, s)),
                pl.BlockSpec((Dp, C), lambda b, s: (0, 0)),
                pl.BlockSpec((C, Dp), lambda b, s: (0, 0)),
                pl.BlockSpec((Dp, 1), lambda b, s: (0, 0)),
                pl.BlockSpec((C, 1), lambda b, s: (0, 0)),
            ],
            out_specs=pl.BlockSpec((1, C, 128), lambda b, s: (b, 0, 0)),
            scratch_shapes=[pltpu.VMEM((C, 128), jnp.float32)],
        ),
        compiler_params=pltpu.CompilerParams(
            # NOTE: 's' must stay "arbitrary" (scratch accumulator).  For B==1
            # on v7x megacore this pass therefore streams from one core only.
            dimension_semantics=("parallel", "arbitrary"),
            vmem_limit_bytes=_VMEM_LIMIT_BYTES),
    )(xf, w1, w2, b1, b2)

    # ---- kernel 2: x * attention, fully parallel tiled elementwise ----------
    out = pl.pallas_call(
        _scale_kernel,
        out_shape=jax.ShapeDtypeStruct((B, C, HW), x.dtype),
        grid_spec=pltpu.PrefetchScalarGridSpec(
            num_scalar_prefetch=0,
            grid=(B, S),
            in_specs=[
                pl.BlockSpec((1, C, ts), lambda b, s: (b, 0, s)),
                pl.BlockSpec((1, C, 128), lambda b, s: (b, 0, 0)),
            ],
            out_specs=pl.BlockSpec((1, C, ts), lambda b, s: (b, 0, s)),
        ),
        compiler_params=pltpu.CompilerParams(
            dimension_semantics=("parallel", "parallel"),
            vmem_limit_bytes=_VMEM_LIMIT_BYTES),
    )(xf, y)

    return out.reshape(B, C, H, W)


# ------------------------------------------------------ params & pure-JAX ref
def init_calayer(key, channel, reduction=16, bias=False):
    """Mimics CALayer(channel, reduction, bias) parameters (1x1 conv weights as
    matrices), pre-padded ONCE to TPU-friendly shapes (D -> multiple of 8)."""
    D = channel // reduction
    assert D >= 1, "channel must be >= reduction"
    Dp = _round_up(max(D, 8), 8)

    k1, k2, k3, k4 = jax.random.split(key, 4)
    s1 = 1.0 / math.sqrt(channel)          # PyTorch Conv2d default init range
    s2 = 1.0 / math.sqrt(D)
    w1 = jax.random.uniform(k1, (D, channel), jnp.float32, -s1, s1)
    w2 = jax.random.uniform(k2, (channel, D), jnp.float32, -s2, s2)
    if bias:
        b1 = jax.random.uniform(k3, (D,), jnp.float32, -s1, s1)
        b2 = jax.random.uniform(k4, (channel,), jnp.float32, -s2, s2)
    else:
        b1 = jnp.zeros((D,), jnp.float32)
        b2 = jnp.zeros((channel,), jnp.float32)

    w1p = jnp.zeros((Dp, channel), jnp.float32).at[:D, :].set(w1)
    w2p = jnp.zeros((channel, Dp), jnp.float32).at[:, :D].set(w2)
    b1p = jnp.zeros((Dp, 1), jnp.float32).at[:D, 0].set(b1)
    b2p = b2.reshape(channel, 1)
    return {'w1': w1p, 'w2': w2p, 'b1': b1p, 'b2': b2p}


def ca_layer_ref(params, x):
    """Plain-JAX reference (identical math; padded weight rows/cols are zero)."""
    pooled = jnp.mean(x.astype(jnp.float32), axis=(2, 3))       # (B, C)
    z = jnp.maximum(pooled @ params['w1'].T + params['b1'][:, 0], 0.0)
    att = jax.nn.sigmoid(z @ params['w2'].T + params['b2'][:, 0])
    return x * att[:, :, None, None]


def _check(got, want, atol, what):
    if not bool(jnp.allclose(got.astype(jnp.float32), want.astype(jnp.float32),
                             atol=atol, rtol=atol)):
        err = float(jnp.max(jnp.abs(got.astype(jnp.float32) -
                                    want.astype(jnp.float32))))
        raise AssertionError(f"Pallas CALayer mismatch ({what}), max abs err = {err}")


# ------------------------------------------------------------------------ main
if __name__ == "__main__":
    key = jax.random.PRNGKey(0)
    kx, kp, kx2, kx3 = jax.random.split(key, 4)

    B, C = 2, 64
    params = init_calayer(kp, C, reduction=16, bias=False)

    # -- case 1: canonical small shape -> fused single-pass path (f32) -------
    x = jax.random.uniform(kx, (B, C, 16, 16), jnp.float32)
    fwd = jax.jit(ca_layer)
    y = jax.block_until_ready(fwd(params, x))
    assert y.shape == x.shape and y.dtype == x.dtype
    _check(y, ca_layer_ref(params, x), 1e-5, "fused f32")

    # -- case 1b: bf16 activations through the same fused path ---------------
    x_bf = x.astype(jnp.bfloat16)
    y_bf = jax.block_until_ready(fwd(params, x_bf))
    assert y_bf.dtype == jnp.bfloat16
    _check(y_bf, ca_layer_ref(params, x_bf), 2e-2, "fused bf16")

    # -- case 2: force the two-pass path with a multi-step reduction (S > 1) --
    x2 = jax.random.uniform(kx2, (B, C, 32, 32), jnp.float32)
    fwd2 = jax.jit(functools.partial(ca_layer, path="two_pass", tile_override=256))
    y2 = jax.block_until_ready(fwd2(params, x2))
    assert y2.shape == x2.shape and y2.dtype == x2.dtype
    _check(y2, ca_layer_ref(params, x2), 1e-5, "two-pass f32")

    # -- case 3: non-128-multiple spatial size, no host-side pad/slice copies --
    x3 = jax.random.uniform(kx3, (1, C, 15, 15), jnp.float32)
    y3 = jax.block_until_ready(jax.jit(ca_layer)(params, x3))
    assert y3.shape == x3.shape
    _check(y3, ca_layer_ref(params, x3), 1e-5, "fused ragged spatial")

    print("KERNEL_OK")
</pallas_src>

<mosaic_0001>
module attributes {stable_mosaic.version = 11 : i64} {
  func.func @_fused_kernel(%arg0: i32, %arg1: memref<1x64x256xf32, #tpu.memory_space<vmem>>, %arg2: memref<8x64xf32, #tpu.memory_space<vmem>>, %arg3: memref<64x8xf32, #tpu.memory_space<vmem>>, %arg4: memref<8x1xf32, #tpu.memory_space<vmem>>, %arg5: memref<64x1xf32, #tpu.memory_space<vmem>>, %arg6: memref<1x64x256xf32, #tpu.memory_space<vmem>>) attributes {dimension_semantics = [#tpu.dimension_semantics<parallel>], iteration_bounds = array<i64: 2>, scalar_prefetch = 0 : i64, scratch_operands = 0 : i64, tpu.core_type = #tpu.core_type<tc>, window_params = [{transform_indices = @transform_0, window_bounds = array<i64: 1, 64, 256>}, {pipeline_mode = #tpu.pipeline_mode<synchronous>, transform_indices = @transform_1, window_bounds = array<i64: 8, 64>}, {pipeline_mode = #tpu.pipeline_mode<synchronous>, transform_indices = @transform_2, window_bounds = array<i64: 64, 8>}, {pipeline_mode = #tpu.pipeline_mode<synchronous>, transform_indices = @transform_3, window_bounds = array<i64: 8, 1>}, {pipeline_mode = #tpu.pipeline_mode<synchronous>, transform_indices = @transform_4, window_bounds = array<i64: 64, 1>}, {transform_indices = @transform_5, window_bounds = array<i64: 1, 64, 256>}]} {
    %c0 = arith.constant 0 : index
    %c0_0 = arith.constant 0 : index
    %c0_1 = arith.constant 0 : index
    %0 = vector.load %arg1[%c0, %c0_0, %c0_1] : memref<1x64x256xf32, #tpu.memory_space<vmem>>, vector<1x64x256xf32>
    %1 = vector.shape_cast %0 : vector<1x64x256xf32> to vector<64x256xf32>
    %cst = arith.constant dense<0.000000e+00> : vector<64xf32>
    %2 = vector.multi_reduction <add>, %1, %cst [1] : vector<64x256xf32> to vector<64xf32>
    %3 = vector.shape_cast %2 : vector<64xf32> to vector<64x1xf32>
    %cst_2 = arith.constant 0.000000e+00 : f32
    %4 = vector.broadcast %cst_2 : f32 to vector<64x128xf32>
    %cst_3 = arith.constant 3.906250e-03 : f32
    %5 = vector.broadcast %cst_3 : f32 to vector<64x1xf32>
    %6 = arith.mulf %3, %5 : vector<64x1xf32>
    %7 = vector.broadcast %6 : vector<64x1xf32> to vector<64x128xf32>
    %8 = arith.addf %4, %7 : vector<64x128xf32>
    %c0_4 = arith.constant 0 : index
    %c0_5 = arith.constant 0 : index
    %9 = vector.load %arg2[%c0_4, %c0_5] : memref<8x64xf32, #tpu.memory_space<vmem>>, vector<8x64xf32>
    %cst_6 = arith.constant dense<0.000000e+00> : vector<8x128xf32>
    %10 = tpu.matmul %9, %8, %cst_6 {dimension_numbers = #tpu.dot_dimension_numbers<[1], [0], [0], [1], [0, 0, 1, 1], [], []>} : vector<8x64xf32>, vector<64x128xf32>, vector<8x128xf32> -> vector<8x128xf32>
    %c0_7 = arith.constant 0 : index
    %c0_8 = arith.constant 0 : index
    %11 = vector.load %arg4[%c0_7, %c0_8] : memref<8x1xf32, #tpu.memory_space<vmem>>, vector<8x1xf32>
    %12 = vector.broadcast %11 : vector<8x1xf32> to vector<8x128xf32>
    %13 = arith.addf %10, %12 : vector<8x128xf32>
    %cst_9 = arith.constant 0.000000e+00 : f32
    %14 = vector.broadcast %cst_9 : f32 to vector<8x128xf32>
    %15 = arith.maximumf %13, %14 : vector<8x128xf32>
    %c0_10 = arith.constant 0 : index
    %c0_11 = arith.constant 0 : index
    %16 = vector.load %arg3[%c0_10, %c0_11] : memref<64x8xf32, #tpu.memory_space<vmem>>, vector<64x8xf32>
    %cst_12 = arith.constant dense<0.000000e+00> : vector<64x128xf32>
    %17 = tpu.matmul %16, %15, %cst_12 {dimension_numbers = #tpu.dot_dimension_numbers<[1], [0], [0], [1], [0, 0, 1, 1], [], []>} : vector<64x8xf32>, vector<8x128xf32>, vector<64x128xf32> -> vector<64x128xf32>
    %c0_13 = arith.constant 0 : index
    %c0_14 = arith.constant 0 : index
    %18 = vector.load %arg5[%c0_13, %c0_14] : memref<64x1xf32, #tpu.memory_space<vmem>>, vector<64x1xf32>
    %19 = vector.broadcast %18 : vector<64x1xf32> to vector<64x128xf32>
    %20 = arith.addf %17, %19 : vector<64x128xf32>
    %21 = arith.negf %20 : vector<64x128xf32>
    %22 = math.exp %21 : vector<64x128xf32>
    %cst_15 = arith.constant 1.000000e+00 : f32
    %23 = vector.broadcast %cst_15 : f32 to vector<64x128xf32>
    %24 = arith.addf %23, %22 : vector<64x128xf32>
    %25 = arith.divf %23, %24 : vector<64x128xf32>
    %26 = vector.extract_strided_slice %25 {offsets = [0, 0], sizes = [64, 1], strides = [1, 1]} : vector<64x128xf32> to vector<64x1xf32>
    %27 = vector.shape_cast %26 : vector<64x1xf32> to vector<1x64x1xf32>
    %28 = vector.broadcast %27 : vector<1x64x1xf32> to vector<1x64x256xf32>
    %29 = arith.mulf %0, %28 : vector<1x64x256xf32>
    %c0_16 = arith.constant 0 : index
    %c0_17 = arith.constant 0 : index
    %c0_18 = arith.constant 0 : index
    %30 = vector.load %arg6[%c0_16, %c0_17, %c0_18] : memref<1x64x256xf32, #tpu.memory_space<vmem>>, vector<1x64x256xf32>
    tpu.vector_store %arg6[%c0_16, %c0_17, %c0_18], %29 {strides = array<i32>} : memref<1x64x256xf32, #tpu.memory_space<vmem>>, vector<1x64x256xf32>,
    return
  }
  func.func @transform_0(%arg0: i32) -> (i32, i32, i32) {
    %c0_i32 = arith.constant 0 : i32
    %c0_i32_0 = arith.constant 0 : i32
    %c0_i32_1 = arith.constant 0 : i32
    return %arg0, %c0_i32, %c0_i32_0 : i32, i32, i32
  }
  func.func @transform_1(%arg0: i32) -> (i32, i32) {
    %c0_i32 = arith.constant 0 : i32
    %c0_i32_0 = arith.constant 0 : i32
    %c0_i32_1 = arith.constant 0 : i32
    return %c0_i32, %c0_i32_0 : i32, i32
  }
  func.func @transform_2(%arg0: i32) -> (i32, i32) {
    %c0_i32 = arith.constant 0 : i32
    %c0_i32_0 = arith.constant 0 : i32
    %c0_i32_1 = arith.constant 0 : i32
    return %c0_i32, %c0_i32_0 : i32, i32
  }
  func.func @transform_3(%arg0: i32) -> (i32, i32) {
    %c0_i32 = arith.constant 0 : i32
    %c0_i32_0 = arith.constant 0 : i32
    %c0_i32_1 = arith.constant 0 : i32
    return %c0_i32, %c0_i32_0 : i32, i32
  }
  func.func @transform_4(%arg0: i32) -> (i32, i32) {
    %c0_i32 = arith.constant 0 : i32
    %c0_i32_0 = arith.constant 0 : i32
    %c0_i32_1 = arith.constant 0 : i32
    return %c0_i32, %c0_i32_0 : i32, i32
  }
  func.func @transform_5(%arg0: i32) -> (i32, i32, i32) {
    %c0_i32 = arith.constant 0 : i32
    %c0_i32_0 = arith.constant 0 : i32
    %c0_i32_1 = arith.constant 0 : i32
    return %arg0, %c0_i32, %c0_i32_0 : i32, i32, i32
  }
}

</mosaic_0001>

<bundles_post_ra>
// kernel: ca_layer.1
= control target key start
LH: loop header
LB: loop body
LE: loop exit
PB: predicated region body
PF: predicated region fallthrough
CT: control target
= control target key end

     0   :  { %s905_s18 = smov 0   ;;  %s1073_s0 = inlined_call_operand.vmem [shape: f32[2,64,256], index: 0, kind: input, shape index: {}]   ;;  %s1074_s1 = inlined_call_operand.vmem [shape: f32[8,64], index: 1, kind: input, shape index: {}]   ;;  %s1075_s2 = inlined_call_operand.vmem [shape: f32[64,8], index: 2, kind: input, shape index: {}]   ;;  %s1076_s3 = inlined_call_operand.vmem [shape: f32[8,1], index: 3, kind: input, shape index: {}]   ;;  %s1077_s4 = inlined_call_operand.vmem [shape: f32[64,1], index: 4, kind: input, shape index: {}]   ;;  %s1078_s5 = inlined_call_operand.vmem [shape: f32[2,64,256], index: 5, kind: output, shape index: {}]  }
   0x1 LB: > { %s724_s19 = sadd.s32 4294967295, %s869_s18   ;;  %p728_p0 = scmp.ge.s32.totalorder %s869_s18, 1  ;;  %s869_s18 = sphi %s905_s18, %s15_s18  }
   0x2   : > { %p187_p1 = scmp.lt.s32.totalorder %s869_s18, 3 }
   0x4   : > { %p188_p2 = pnand %p728_p0, %p187_p1 }
   0x5   : > { %p215_p3 = scmp.lt.s32.totalorder (!%p188_p2), %s724_s19, 1  ;;  %v871_v24 = vmov (!%p188_p2), 0.0|0.0   ;;  %vm872_vm0 = vmmov (!%p188_p2), 0   ;;  %v873_v25 = vmov (!%p188_p2), 0.0   ;;  %v282_v26 = vld [vmem:[%s1076_s3] sm:$0xff] (!%p188_p2)  ;;  %v874_v27 = vmov (!%p188_p2), 0  }
   0x6   : > { %191 = sbr.rel (%p188_p2) target bundleno = 789 (0x315), region = 40  ;;  %805 = vmatprep.subr.bf16.mxu0 (!%p188_p2), %v871_v24  ;;  %788 = vmatprep.mubr.msk.f32.mxu0 (!%p188_p2), %vm872_vm0, %v873_v25  ;;  %v281_v48 = vld [vmem:[%s1074_s1] sm:$0xff] (!%p188_p2)  ;;  %vm288_vm1 = vcmask (!%p188_p2), 523264   ;;  %vm419_vm2 = vcmask (!%p188_p2), 64512   ;;  %v372_v51 = vld [vmem:[%s1077_s4 + $0x8] sm:$0xff] (!%p188_p2)  ;;  %v373_v52 = vld [vmem:[%s1077_s4 + $0x10] sm:$0xff] (!%p188_p2) }
   0x7   : > { %829 = vset.pattern.permute.xlu0 (!%p188_p2), %v874_v27  ;;  %830 = vset.pattern.permute.xlu1 (!%p188_p2), %v874_v27  ;;  %v363_v49 = vld [vmem:[%s1075_s2] sm:$0xff] (!%p188_p2)  ;;  %v374_v53 = vld [vmem:[%s1077_s4 + $0x18] sm:$0xff] (!%p188_p2)  ;;  %v376_v55 = vld [vmem:[%s1077_s4 + $0x28] sm:$0xff] (!%p188_p2) }
   0x8   : > { %793 = vmatprep.mubr.msk.f32.mxu1 (!%p188_p2), %vm419_vm2, %v363_v49  ;;  %v371_v50 = vld [vmem:[%s1077_s4] sm:$0xff] (!%p188_p2)  ;;  %v377_v56 = vld [vmem:[%s1077_s4 + $0x30] sm:$0xff] (!%p188_p2)  ;;  %v378_v57 = vld [vmem:[%s1077_s4 + $0x38] sm:$0xff] (!%p188_p2) }
   0x9   : > { %v375_v54 = vld [vmem:[%s1077_s4 + $0x20] sm:$0xff] (!%p188_p2)  ;;  %v364_v63 = vld [vmem:[%s1075_s2 + $0x8] sm:$0xff] (!%p188_p2) }
   0xd   : > { %s1080_s19 = smov (!%p215_p3, %s724_s19), 1 }
   0xe   : > { %s752_s20 = sshll.u32 %s1080_s19, 7 }
   0xf   : > { %s219_s23 = scalar_lea.vmem %s1073_s0, %s752_s20  ;;  %s1036_s15 = scalar_lea.vmem %s1078_s5, %s752_s20 }
  0x10   : > { %v921_v0 = vld [vmem:[%s219_s23 + $0x20] sm:$0xff]  ;;  %v923_v1 = vld [vmem:[%s219_s23 + $0x28] sm:$0xff]  ;;  %v931_v5 = vld [vmem:[%s219_s23 + $0x30] sm:$0xff] }
  0x11   : > { %v925_v2 = vld [vmem:[%s219_s23] sm:$0xff]  ;;  %v247_v3 = vadd.f32 %v923_v1, %v921_v0  ;;  %v929_v4 = vld [vmem:[%s219_s23 + $0x8] sm:$0xff]  ;;  %v933_v6 = vld [vmem:[%s219_s23 + $0x38] sm:$0xff] }
  0x12   : > { %v241_v7 = vadd.f32 %v929_v4, %v925_v2  ;;  %v937_v8 = vld [vmem:[%s219_s23 + $0x10] sm:$0xff]  ;;  %v939_v9 = vld [vmem:[%s219_s23 + $0x18] sm:$0xff]  ;;  %v250_v10 = vadd.f32 %v933_v6, %v931_v5  ;;  %v949_v14 = vld [vmem:[%s219_s23 + $0x40] sm:$0xff] }
  0x13   : > { %248 = vadd.xlane.f32.xlu1 %v247_v3  ;;  %v244_v11 = vadd.f32 %v939_v9, %v937_v8  ;;  %v945_v12 = vld [vmem:[%s219_s23 + $0x50] sm:$0xff]  ;;  %v947_v13 = vld [vmem:[%s219_s23 + $0x58] sm:$0xff]  ;;  %v951_v15 = vld [vmem:[%s219_s23 + $0x48] sm:$0xff] }
  0x14   : > { %242 = vadd.xlane.f32.xlu0 %v241_v7  ;;  %v256_v16 = vadd.f32 %v947_v13, %v945_v12  ;;  %v253_v17 = vadd.f32 %v951_v15, %v949_v14  ;;  %v957_v18 = vld [vmem:[%s219_s23 + $0x70] sm:$0xff]  ;;  %v959_v19 = vld [vmem:[%s219_s23 + $0x78] sm:$0xff]  ;;  %v961_v20 = vld [vmem:[%s219_s23 + $0x60] sm:$0xff] }
  0x15   : > { %v963_v21 = vld [vmem:[%s219_s23 + $0x68] sm:$0xff]  ;;  %v262_v22 = vadd.f32 %v959_v19, %v957_v18  ;;  %v365_v3 = vld [vmem:[%s1075_s2 + $0x10] sm:$0xff]  ;;  %v366_v7 = vld [vmem:[%s1075_s2 + $0x18] sm:$0xff] }
  0x16   : > { %v259_v23 = vadd.f32 %v963_v21, %v961_v20 }
  0x17   : > { %251 = vadd.xlane.f32.xlu1 %v250_v10  ;;  %v367_v10 = vld [vmem:[%s1075_s2 + $0x20] sm:$0xff] }
  0x18   : > { %245 = vadd.xlane.f32.xlu0 %v244_v11  ;;  %v368_v11 = vld [vmem:[%s1075_s2 + $0x28] sm:$0xff] }
  0x1b   : > { %257 = vadd.xlane.f32.xlu1 %v256_v16  ;;  %v369_v16 = vld [vmem:[%s1075_s2 + $0x30] sm:$0xff] }
  0x1c   : > { %254 = vadd.xlane.f32.xlu0 %v253_v17  ;;  %v370_v17 = vld [vmem:[%s1075_s2 + $0x38] sm:$0xff] }
  0x1f   : > { %263 = vadd.xlane.f32.xlu1 %v262_v22 }
  0x20   : > { %260 = vadd.xlane.f32.xlu0 %v259_v23 }
  0x30   : > { %381 = vperm.xlu1 %830, %v371_v50  }
  0x34   : > { %386 = vperm.xlu1 %830, %v372_v51  }
  0x36   : > { %285 = vperm.xlu0 %829, %v282_v26  }
  0x38   : > { %391 = vperm.xlu1 %830, %v373_v52  }
  0x3c   : > { %396 = vperm.xlu1 %830, %v374_v53  }
  0x40   : > { %401 = vperm.xlu1 %830, %v375_v54  }
  0x44   : > { %406 = vperm.xlu1 %830, %v376_v55  }
  0x48   : > { %411 = vperm.xlu1 %830, %v377_v56  }
  0x4c   : > { %416 = vperm.xlu1 %830, %v378_v57  }
  0xa0   : > { %v249_v28 = vpop.xlane.xlu1 %248 }
  0xa1   : > { %v243_v29 = vpop.xlane.xlu0 %242  ;;  %v267_v34 = vmul.f32 0.00390625, %v249_v28 }
  0xa2   : > { %v265_v32 = vmul.f32 0.00390625, %v243_v29 }
  0xa4   : > { %v252_v30 = vpop.xlane.xlu1 %251 }
  0xa5   : > { %v246_v31 = vpop.xlane.xlu0 %245  ;;  %v268_v35 = vmul.f32 0.00390625, %v252_v30 }
  0xa6   : > { %v266_v33 = vmul.f32 0.00390625, %v246_v31 }
  0xa7   : > { %v809_v41 = vpack.c.bf16 %v268_v35, %v267_v34 }
  0xa8   : > { %v806_v36 = vpack.c.bf16 %v266_v33, %v265_v32  ;;  %v258_v37 = vpop.xlane.xlu1 %257 }
  0xa9   : > { %v255_v38 = vpop.xlane.xlu0 %254  ;;  %v270_v39 = vmul.f32 0.00390625, %v258_v37 }
  0xaa   : > { %807 = vmatpush3.bf16.msra.mxu0 %v806_v36  ;;  %v269_v40 = vmul.f32 0.00390625, %v255_v38 }
  0xab   : > { %808 = vmatprep.subr.bf16.mxu0 %v871_v24 }
  0xac   : > { %v264_v42 = vpop.xlane.xlu1 %263  ;;  %v812_v44 = vpack.c.bf16 %v270_v39, %v269_v40 }
  0xad   : > { %v261_v43 = vpop.xlane.xlu0 %260  ;;  %v272_v45 = vmul.f32 0.00390625, %v264_v42 }
  0xae   : > { %810 = vmatpush3.bf16.msra.mxu0 %v809_v41  ;;  %v271_v46 = vmul.f32 0.00390625, %v261_v43 }
  0xaf   : > { %811 = vmatprep.subr.bf16.mxu0 %v871_v24 }
  0xb0   : > { %v815_v47 = vpack.c.bf16 %v272_v45, %v271_v46  ;;  %v382_v22 = vpop.permute.xlu1 %381 }
  0xb2   : > { %813 = vmatpush3.bf16.msra.mxu0 %v812_v44 }
  0xb3   : > { %814 = vmatprep.subr.bf16.mxu0 %v871_v24 }
  0xb4   : > { %v387_v23 = vpop.permute.xlu1 %386 }
  0xb5   : > { %v286_v58 = vpop.permute.xlu0 %285 }
  0xb6   : > { %816 = vmatpush3.bf16.msra.mxu0 %v815_v47 }
  0xb8   : > { %v392_v24 = vpop.permute.xlu1 %391 }
  0xb9   : > { %789 = vmatmul.mubr.msk.f32.vlgmr.msra.gmra.mrb[0].mxu0 %vm288_vm1, %v281_v48 }
  0xbc   : > { %v397_v25 = vpop.permute.xlu1 %396 }
  0xc0   : > { %v402_v26 = vpop.permute.xlu1 %401 }
  0xc4   : > { %v407_v27 = vpop.permute.xlu1 %406 }
  0xc8   : > { %v412_v37 = vpop.permute.xlu1 %411 }
  0xcc   : > { %v417_v46 = vpop.permute.xlu1 %416 }
 0x18c   : > { %v358_v59 = vpop.f32.mrb[0].mxu0 }
 0x18d   : > { %v359_v60 = vadd.f32 %v358_v59, %v286_v58  ;;  %v790_v61 = vpop.f32.mrb[1].mxu0 }
 0x18f   : > { %v362_v62 = vmax.f32 %v359_v60, 0.0 }
 0x191   : > { %791 = vmatprep.subr.mxu1 %v362_v62 }
 0x192   : > { %792 = vmatpush3.msra.mxu1 %v362_v62 }
 0x193   : > { %794 = vmatmul.mubr.msk.f32.vlgmr.msra.gmra.mrb[0].mxu1 %vm419_vm2, %v364_v63 }
 0x194   : > { %796 = vmatprep.mubr.msk.f32.mxu1 %vm419_vm2, %v365_v3 }
 0x197   : > { %797 = vmatmul.mubr.msk.f32.gmra.mrb[2].mxu1 %vm419_vm2, %v366_v7 }
 0x198   : > { %799 = vmatprep.mubr.msk.f32.mxu1 %vm419_vm2, %v367_v10 }
 0x19b   : > { %800 = vmatmul.mubr.msk.f32.gmra.mrb[4].mxu1 %vm419_vm2, %v368_v11 }
 0x19c   : > { %802 = vmatprep.mubr.msk.f32.mxu1 %vm419_vm2, %v369_v16 }
 0x19f   : > { %803 = vmatmul.mubr.msk.f32.gmra.mrb[6].mxu1 %vm419_vm2, %v370_v17 }
 0x266   : > { %v795_v28 = vpop.f32.mrb[0].mxu1 }
 0x267   : > { %v516_v29 = vadd.f32 %v795_v28, %v387_v23  ;;  %v510_v30 = vpop.f32.mrb[1].mxu1 }
 0x268   : > { %v511_v31 = vadd.f32 %v510_v30, %v382_v22 }
 0x269   : > { %v743_v32 = vmul.f32 -1.442695, %v516_v29 }
 0x26a   : > { %v742_v33 = vmul.f32 -1.442695, %v511_v31  ;;  %v798_v34 = vpop.f32.mrb[2].mxu1 }
 0x26b   : > { %831 = vpow2.f32 %v743_v32  ;;  %v526_v35 = vadd.f32 %v798_v34, %v397_v25  ;;  %v520_v36 = vpop.f32.mrb[3].mxu1 }
 0x26c   : > { %833 = vpow2.f32 %v742_v33  ;;  %v521_v38 = vadd.f32 %v520_v36, %v392_v24 }
 0x26d   : > { %v745_v39 = vmul.f32 -1.442695, %v526_v35 }
 0x26e   : > { %v744_v40 = vmul.f32 -1.442695, %v521_v38  ;;  %v801_v41 = vpop.f32.mrb[4].mxu1 }
 0x26f   : > { %835 = vpow2.f32 %v745_v39  ;;  %v536_v42 = vadd.f32 %v801_v41, %v407_v27  ;;  %v530_v43 = vpop.f32.mrb[5].mxu1 }
 0x270   : > { %837 = vpow2.f32 %v744_v40  ;;  %v531_v44 = vadd.f32 %v530_v43, %v402_v26 }
 0x271   : > { %v747_v45 = vmul.f32 -1.442695, %v536_v42 }
 0x272   : > { %v746_v47 = vmul.f32 -1.442695, %v531_v44  ;;  %v804_v48 = vpop.f32.mrb[6].mxu1 }
 0x273   : > { %839 = vpow2.f32 %v747_v45  ;;  %v546_v49 = vadd.f32 %v804_v48, %v417_v46  ;;  %v540_v50 = vpop.f32.mrb[7].mxu1 }
 0x274   : > { %841 = vpow2.f32 %v746_v47  ;;  %v541_v51 = vadd.f32 %v540_v50, %v412_v37 }
 0x275   : > { %v832_v52 = vpop.eup %831  ;;  %v749_v53 = vmul.f32 -1.442695, %v546_v49 }
 0x276   : > { %v834_v54 = vpop.eup %833  ;;  %v574_v55 = vadd.f32 1.0, %v832_v52  ;;  %v748_v56 = vmul.f32 -1.442695, %v541_v51 }
 0x277   : > { %v573_v57 = vadd.f32 1.0, %v834_v54  ;;  %843 = vpow2.f32 %v749_v53 }
 0x278   : > { %845 = vrcp.f32 %v574_v55 }
 0x279   : > { %v836_v58 = vpop.eup %835  ;;  %847 = vrcp.f32 %v573_v57 }
 0x27a   : > { %v838_v59 = vpop.eup %837  ;;  %v576_v60 = vadd.f32 1.0, %v836_v58  ;;  %849 = vpow2.f32 %v748_v56 }
 0x27b   : > { %v575_v61 = vadd.f32 1.0, %v838_v59 }
 0x27c   : > { %851 = vrcp.f32 %v576_v60 }
 0x27d   : > { %v840_v62 = vpop.eup %839  ;;  %853 = vrcp.f32 %v575_v61 }
 0x27e   : > { %v842_v63 = vpop.eup %841  ;;  %v578_v3 = vadd.f32 1.0, %v840_v62 }
 0x27f   : > { %v577_v7 = vadd.f32 1.0, %v842_v63 }
 0x280   : > { %855 = vrcp.f32 %v578_v3 }
 0x281   : > { %v844_v10 = vpop.eup %843  ;;  %857 = vrcp.f32 %v577_v7 }
 0x282   : > { %v846_v11 = vpop.eup %845  ;;  %v580_v16 = vadd.f32 1.0, %v844_v10 }
 0x283   : > { %v848_v17 = vpop.eup %847  ;;  %604 = vperm.xlu1 %830, %v846_v11  }
 0x284   : > { %v850_v22 = vpop.eup %849  ;;  %859 = vrcp.f32 %v580_v16  ;;  %599 = vperm.xlu0 %829, %v848_v17  }
 0x285   : > { %v579_v23 = vadd.f32 1.0, %v850_v22 }
 0x286   : > { %v852_v24 = vpop.eup %851 }
 0x287   : > { %v854_v25 = vpop.eup %853  ;;  %861 = vrcp.f32 %v579_v23  ;;  %614 = vperm.xlu1 %830, %v852_v24  }
 0x288   : > { %609 = vperm.xlu0 %829, %v854_v25  }
 0x28a   : > { %v856_v26 = vpop.eup %855 }
 0x28b   : > { %v858_v27 = vpop.eup %857  ;;  %624 = vperm.xlu1 %830, %v856_v26  }
 0x28c   : > { %619 = vperm.xlu0 %829, %v858_v27  }
 0x28e   : > { %v860_v28 = vpop.eup %859 }
 0x28f   : > { %634 = vperm.xlu1 %830, %v860_v28  }
 0x291   : > { %v862_v29 = vpop.eup %861 }
 0x292   : > { %629 = vperm.xlu0 %829, %v862_v29  }
 0x302   : > { %v605_v30 = vpop.permute.xlu1 %604 }
 0x303   : > { %v639_v31 = vmul.f32 %v605_v30, %v937_v8  ;;  %v640_v32 = vmul.f32 %v605_v30, %v939_v9  ;;  %v600_v33 = vpop.permute.xlu0 %599 }
 0x304   : > { %v637_v34 = vmul.f32 %v600_v33, %v925_v2  ;;  %v638_v35 = vmul.f32 %v600_v33, %v929_v4 }
 0x305   : > { %655 = vst [vmem:[%s1036_s15 + $0x10] sm:$0xff] %v639_v31  ;;  %656 = vst [vmem:[%s1036_s15 + $0x18] sm:$0xff] %v640_v32 }
 0x306   : > { %653 = vst [vmem:[%s1036_s15] sm:$0xff] %v637_v34  ;;  %654 = vst [vmem:[%s1036_s15 + $0x8] sm:$0xff] %v638_v35  ;;  %v615_v36 = vpop.permute.xlu1 %614 }
 0x307   : > { %v643_v37 = vmul.f32 %v615_v36, %v931_v5  ;;  %v644_v8 = vmul.f32 %v615_v36, %v933_v6  ;;  %v610_v9 = vpop.permute.xlu0 %609 }
 0x308   : > { %v641_v38 = vmul.f32 %v610_v9, %v921_v0  ;;  %v642_v2 = vmul.f32 %v610_v9, %v923_v1 }
 0x309   : > { %659 = vst [vmem:[%s1036_s15 + $0x30] sm:$0xff] %v643_v37  ;;  %660 = vst [vmem:[%s1036_s15 + $0x38] sm:$0xff] %v644_v8 }
 0x30a   : > { %657 = vst [vmem:[%s1036_s15 + $0x20] sm:$0xff] %v641_v38  ;;  %658 = vst [vmem:[%s1036_s15 + $0x28] sm:$0xff] %v642_v2  ;;  %v625_v4 = vpop.permute.xlu1 %624 }
 0x30b   : > { %v647_v39 = vmul.f32 %v625_v4, %v945_v12  ;;  %v648_v5 = vmul.f32 %v625_v4, %v947_v13  ;;  %v620_v6 = vpop.permute.xlu0 %619 }
 0x30c   : > { %v645_v40 = vmul.f32 %v620_v6, %v949_v14  ;;  %v646_v0 = vmul.f32 %v620_v6, %v951_v15 }
 0x30d   : > { %663 = vst [vmem:[%s1036_s15 + $0x50] sm:$0xff] %v647_v39  ;;  %664 = vst [vmem:[%s1036_s15 + $0x58] sm:$0xff] %v648_v5 }
 0x30e   : > { %661 = vst [vmem:[%s1036_s15 + $0x40] sm:$0xff] %v645_v40  ;;  %662 = vst [vmem:[%s1036_s15 + $0x48] sm:$0xff] %v646_v0  ;;  %v635_v1 = vpop.permute.xlu1 %634 }
 0x30f   : > { %v651_v41 = vmul.f32 %v635_v1, %v957_v18  ;;  %v652_v42 = vmul.f32 %v635_v1, %v959_v19 }
 0x311   : > { %667 = vst [vmem:[%s1036_s15 + $0x70] sm:$0xff] %v651_v41  ;;  %668 = vst [vmem:[%s1036_s15 + $0x78] sm:$0xff] %v652_v42  ;;  %v630_v12 = vpop.permute.xlu0 %629 }
 0x312   : > { %v649_v13 = vmul.f32 %v630_v12, %v961_v20  ;;  %v650_v43 = vmul.f32 %v630_v12, %v963_v21 }
 0x314   : > { %665 = vst [vmem:[%s1036_s15 + $0x60] sm:$0xff] %v649_v13  ;;  %666 = vst [vmem:[%s1036_s15 + $0x68] sm:$0xff] %v650_v43 }
 0x315 PF: > { %s15_s18 = sadd.s32 1, %s869_s18  }
 0x316   : > { %p12_p4 = scmp.ge.s32.totalorder %s15_s18, 4  }
 0x318   :  { %14 = sbr.rel (!%p12_p4) target bundleno = 1 (0x1), region = 70 }

</bundles_post_ra>
